<compile_context>
chip_gen: v6e
topology: v6e:2x2x1
jax: 0.10.0
libtpu: 0.0.40
codegen_flags: <defaults>
</compile_context>

<pallas_src>
import functools

import jax
import jax.numpy as jnp
from jax.experimental import pallas as pl
from jax.experimental.pallas import tpu as pltpu


def _normalize_kernel(x_ref, out_ref, mean_ref, std_ref, *, unbiased, epsilon):
    # x_ref: (TB, C, T_HW). The channel reduction (axis=1) is entirely inside the
    # block, so every (batch row, lane) column is independent.
    # NOTE: trailing lane/batch blocks may be partial. OOB lanes/rows then hold
    # unspecified data, but they never contaminate in-bounds columns (the
    # reduction axis C is always fully in-bounds) and OOB stores are masked.
    # Do not move the reduction onto the lane axis without re-adding padding.
    x = x_ref[...].astype(jnp.float32)
    c = x.shape[1]

    # Compile-time constant scales (no runtime divides).
    inv_c = 1.0 / float(c)
    # TODO(synk): PyTorch's unbiased var with C == 1 is NaN; here we fall back to
    # the biased denominator (variance 0, std = sqrt(eps)) for that degenerate case.
    denom = float(c - 1) if (unbiased and c > 1) else float(c)
    inv_denom = 1.0 / denom

    mean = jnp.sum(x, axis=1, keepdims=True) * inv_c                 # (TB, 1, T)
    diff = x - mean
    var = jnp.sum(diff * diff, axis=1, keepdims=True) * inv_denom    # (TB, 1, T)

    v = var + epsilon
    inv_std = jax.lax.rsqrt(v)        # EUP transcendental (free VLIW slot)
    std = v * inv_std                 # sqrt(v) derived from rsqrt -> consistent with out

    out_ref[...] = (diff * inv_std).astype(out_ref.dtype)
    mean_ref[...] = mean.astype(mean_ref.dtype)
    std_ref[...] = std.astype(std_ref.dtype)


def _round_up(x, m):
    return ((x + m - 1) // m) * m


def normalize(x, *, dim=1, unbiased=True, epsilon=0.00015):
    """Training-mode forward of `Normalize` for NCHW input, dim=1.

    Returns (transformed_x, mean_, std_); mean_/std_ have keepdim=True shape
    [B, 1, H, W], matching the PyTorch module's buffers."""
    assert x.ndim == 4 and dim == 1, "kernel implemented for NCHW input with dim=1"
    B, C, H, W = x.shape
    HW = H * W
    itemsize = jnp.dtype(x.dtype).itemsize

    # Generation-aware VMEM ceiling (v7x: 64 MiB physical, v5e/v6e: 128 MiB).
    try:
        vmem_cap = int(pltpu.get_tpu_info().vmem_capacity_bytes)
    except Exception:  # pragma: no cover - conservative fallback
        vmem_cap = 64 << 20

    # Target ~2 MiB of f32 work per block (4 MiB on 128 MiB-VMEM chips): large
    # enough to sit near the HBM roofline (>=1 MiB tiles measured ~85%), small
    # enough that double-buffered I/O + in-kernel f32 temporaries fit v7x VMEM.
    target_block_bytes = (4 << 20) if vmem_cap >= (96 << 20) else (2 << 20)
    target_elems = target_block_bytes // 4  # in f32 elements

    hw_128 = _round_up(HW, 128)
    # Lane tile: multiple of 128 (unmasked vst on full blocks), sized from C.
    t_hw = min(hw_128, max(128, (target_elems // max(C, 1)) // 128 * 128))
    # Batch tile: fill the remaining element budget (amortizes ~0.35 us/step
    # grid overhead and makes each DMA row TB x larger for small-HW shapes).
    tb = max(1, min(B, target_elems // (C * t_hw)))

    # v7x has 2 TensorCores per chip: guarantee >= 2 parallel grid steps.
    if pl.cdiv(B, tb) * pl.cdiv(HW, t_hw) < 2:
        if B >= 2:
            tb = pl.cdiv(B, 2)
        elif hw_128 > 128:
            t_hw = max(128, _round_up(pl.cdiv(HW, 2), 128))

    grid = (pl.cdiv(B, tb), pl.cdiv(HW, t_hw))

    # No padding / post-slice: trailing partial blocks are masked by Pallas, so
    # total HBM traffic is exactly one read of x and one write of each output.
    x2 = x.reshape(B, C, HW)

    kernel = functools.partial(_normalize_kernel, unbiased=unbiased, epsilon=epsilon)

    # VMEM budget: double-buffered in/out/stat pipeline tiles + in-kernel f32
    # temporaries (x upcast, diff, f32 result before the output cast).
    block_io = tb * C * t_hw * itemsize
    stat_io = 2 * tb * t_hw * itemsize
    temps = 3 * tb * C * t_hw * 4
    vmem_bytes = 2 * (2 * block_io + stat_io) + temps + (2 << 20)
    vmem_limit = int(min(max(vmem_bytes, 16 << 20), int(vmem_cap * 0.75)))

    out, mean_, std_ = pl.pallas_call(
        kernel,
        out_shape=(
            jax.ShapeDtypeStruct((B, C, HW), x.dtype),
            jax.ShapeDtypeStruct((B, 1, HW), x.dtype),
            jax.ShapeDtypeStruct((B, 1, HW), x.dtype),
        ),
        grid_spec=pltpu.PrefetchScalarGridSpec(
            num_scalar_prefetch=0,
            grid=grid,
            in_specs=[pl.BlockSpec((tb, C, t_hw), lambda b, t: (b, 0, t))],
            out_specs=(
                pl.BlockSpec((tb, C, t_hw), lambda b, t: (b, 0, t)),
                pl.BlockSpec((tb, 1, t_hw), lambda b, t: (b, 0, t)),
                pl.BlockSpec((tb, 1, t_hw), lambda b, t: (b, 0, t)),
            ),
        ),
        compiler_params=pltpu.CompilerParams(
            dimension_semantics=("parallel", "parallel"),
            vmem_limit_bytes=vmem_limit,
        ),
    )(x2)

    return (
        out.reshape(B, C, H, W),
        mean_.reshape(B, 1, H, W),
        std_.reshape(B, 1, H, W),
    )


def _reference(x, dim=1, unbiased=True, epsilon=0.00015):
    x32 = x.astype(jnp.float32)
    mean = jnp.mean(x32, axis=dim, keepdims=True)
    ddof = 1 if unbiased else 0
    var = jnp.var(x32, axis=dim, keepdims=True, ddof=ddof)
    std = jnp.sqrt(var + epsilon)
    return (x32 - mean) / std, mean, std


if __name__ == "__main__":
    key = jax.random.PRNGKey(0)
    x = jax.random.normal(key, (2, 4, 16, 16), dtype=jnp.float32)

    out, mean_, std_ = normalize(x, dim=1, unbiased=True, epsilon=0.00015)
    jax.block_until_ready(out)

    ref_out, ref_mean, ref_std = _reference(x)
    assert jnp.allclose(out, ref_out, atol=1e-5, rtol=1e-5)
    assert jnp.allclose(mean_, ref_mean, atol=1e-5, rtol=1e-5)
    assert jnp.allclose(std_, ref_std, atol=1e-5, rtol=1e-5)

    print("KERNEL_OK")
</pallas_src>

<mosaic_0001>
module attributes {stable_mosaic.version = 11 : i64} {
  func.func @_normalize_kernel(%arg0: i32, %arg1: i32, %arg2: memref<1x4x256xf32, #tpu.memory_space<vmem>>, %arg3: memref<1x4x256xf32, #tpu.memory_space<vmem>>, %arg4: memref<1x1x256xf32, #tpu.memory_space<vmem>>, %arg5: memref<1x1x256xf32, #tpu.memory_space<vmem>>) attributes {dimension_semantics = [#tpu.dimension_semantics<parallel>, #tpu.dimension_semantics<parallel>], iteration_bounds = array<i64: 2, 1>, scalar_prefetch = 0 : i64, scratch_operands = 0 : i64, tpu.core_type = #tpu.core_type<tc>, window_params = [{transform_indices = @transform_0, window_bounds = array<i64: 1, 4, 256>}, {transform_indices = @transform_1, window_bounds = array<i64: 1, 4, 256>}, {transform_indices = @transform_2, window_bounds = array<i64: 1, 1, 256>}, {transform_indices = @transform_3, window_bounds = array<i64: 1, 1, 256>}]} {
    %c0 = arith.constant 0 : index
    %c0_0 = arith.constant 0 : index
    %c0_1 = arith.constant 0 : index
    %0 = vector.load %arg2[%c0, %c0_0, %c0_1] : memref<1x4x256xf32, #tpu.memory_space<vmem>>, vector<1x4x256xf32>
    %cst = arith.constant dense<0.000000e+00> : vector<1x256xf32>
    %1 = vector.multi_reduction <add>, %0, %cst [1] : vector<1x4x256xf32> to vector<1x256xf32>
    %2 = vector.shape_cast %1 : vector<1x256xf32> to vector<1x1x256xf32>
    %cst_2 = arith.constant 2.500000e-01 : f32
    %3 = vector.broadcast %cst_2 : f32 to vector<1x1x256xf32>
    %4 = arith.mulf %2, %3 : vector<1x1x256xf32>
    %5 = vector.broadcast %4 : vector<1x1x256xf32> to vector<1x4x256xf32>
    %6 = arith.subf %0, %5 : vector<1x4x256xf32>
    %7 = arith.mulf %6, %6 : vector<1x4x256xf32>
    %cst_3 = arith.constant dense<0.000000e+00> : vector<1x256xf32>
    %8 = vector.multi_reduction <add>, %7, %cst_3 [1] : vector<1x4x256xf32> to vector<1x256xf32>
    %9 = vector.shape_cast %8 : vector<1x256xf32> to vector<1x1x256xf32>
    %cst_4 = arith.constant 0.333333343 : f32
    %10 = vector.broadcast %cst_4 : f32 to vector<1x1x256xf32>
    %11 = arith.mulf %9, %10 : vector<1x1x256xf32>
    %cst_5 = arith.constant 1.500000e-04 : f32
    %12 = vector.broadcast %cst_5 : f32 to vector<1x1x256xf32>
    %13 = arith.addf %11, %12 : vector<1x1x256xf32>
    %14 = math.rsqrt %13 : vector<1x1x256xf32>
    %15 = arith.mulf %13, %14 : vector<1x1x256xf32>
    %16 = vector.broadcast %14 : vector<1x1x256xf32> to vector<1x4x256xf32>
    %17 = arith.mulf %6, %16 : vector<1x4x256xf32>
    %c0_6 = arith.constant 0 : index
    %c0_7 = arith.constant 0 : index
    %c0_8 = arith.constant 0 : index
    %18 = vector.load %arg3[%c0_6, %c0_7, %c0_8] : memref<1x4x256xf32, #tpu.memory_space<vmem>>, vector<1x4x256xf32>
    tpu.vector_store %arg3[%c0_6, %c0_7, %c0_8], %17 {strides = array<i32>} : memref<1x4x256xf32, #tpu.memory_space<vmem>>, vector<1x4x256xf32>,
    %c0_9 = arith.constant 0 : index
    %c0_10 = arith.constant 0 : index
    %c0_11 = arith.constant 0 : index
    %19 = vector.load %arg4[%c0_9, %c0_10, %c0_11] : memref<1x1x256xf32, #tpu.memory_space<vmem>>, vector<1x1x256xf32>
    tpu.vector_store %arg4[%c0_9, %c0_10, %c0_11], %4 {strides = array<i32>} : memref<1x1x256xf32, #tpu.memory_space<vmem>>, vector<1x1x256xf32>,
    %c0_12 = arith.constant 0 : index
    %c0_13 = arith.constant 0 : index
    %c0_14 = arith.constant 0 : index
    %20 = vector.load %arg5[%c0_12, %c0_13, %c0_14] : memref<1x1x256xf32, #tpu.memory_space<vmem>>, vector<1x1x256xf32>
    tpu.vector_store %arg5[%c0_12, %c0_13, %c0_14], %15 {strides = array<i32>} : memref<1x1x256xf32, #tpu.memory_space<vmem>>, vector<1x1x256xf32>,
    return
  }
  func.func @transform_0(%arg0: i32, %arg1: i32) -> (i32, i32, i32) {
    %c0_i32 = arith.constant 0 : i32
    %c0_i32_0 = arith.constant 0 : i32
    return %arg0, %c0_i32, %arg1 : i32, i32, i32
  }
  func.func @transform_1(%arg0: i32, %arg1: i32) -> (i32, i32, i32) {
    %c0_i32 = arith.constant 0 : i32
    %c0_i32_0 = arith.constant 0 : i32
    return %arg0, %c0_i32, %arg1 : i32, i32, i32
  }
  func.func @transform_2(%arg0: i32, %arg1: i32) -> (i32, i32, i32) {
    %c0_i32 = arith.constant 0 : i32
    %c0_i32_0 = arith.constant 0 : i32
    return %arg0, %c0_i32, %arg1 : i32, i32, i32
  }
  func.func @transform_3(%arg0: i32, %arg1: i32) -> (i32, i32, i32) {
    %c0_i32 = arith.constant 0 : i32
    %c0_i32_0 = arith.constant 0 : i32
    return %arg0, %c0_i32, %arg1 : i32, i32, i32
  }
}

</mosaic_0001>

<bundles_post_ra>
// kernel: tpu_custom_call.1
= control target key start
LH: loop header
LB: loop body
LE: loop exit
PB: predicated region body
PF: predicated region fallthrough
CT: control target
= control target key end

     0   :  { %9 = vsyncpa [#allocation3], 0  ;;  %s1073_s0 = inlined_call_operand.hbm [shape: f32[2,4,256], index: 0, kind: input, shape index: {}]   ;;  %s1074_s1 = inlined_call_operand.hbm [shape: f32[2,4,256], index: 1, kind: output, shape index: {0}]   ;;  %s1075_s2 = inlined_call_operand.hbm [shape: f32[2,1,256], index: 2, kind: output, shape index: {1}]   ;;  %s1076_s3 = inlined_call_operand.hbm [shape: f32[2,1,256], index: 3, kind: output, shape index: {2}]  }
   0x1   :  { %11 = vsyncpa [#allocation3 + $0x1], 0 }
   0x2   :  { %12 = vsyncpa [#allocation4], 0 }
   0x3   :  { %14 = vsyncpa [#allocation4 + $0x1], 0 }
   0x4   :  { %15 = vsyncpa [#allocation7], 0 }
   0x5   :  { %17 = vsyncpa [#allocation7 + $0x1], 0  ;;  %s834_s12 = smov 0   ;;  %s836_s13 = smov 0  }
   0x6   :  { %s838_s14 = smov 0   ;;  %s840_s15 = smov 0  }
   0x7   :  { %s842_s16 = smov 0   ;;  %s844_s17 = smov 0  }
   0x8 LB: > { %s865_s18 = sadd.s32 4294967295, %s807_s17   ;;  %s539_s19 = sadd.s32 4294967294, %s807_s17   ;;  %s807_s17 = sphi %s844_s17, %s23_s17   ;;  %s803_s16 = sphi %s842_s16, %s1090_s16   ;;  %s799_s15 = sphi %s840_s15, %s1089_s15   ;;  %s795_s14 = sphi %s838_s14, %s1088_s14   ;;  %s791_s13 = sphi %s836_s13, %s1087_s13   ;;  %s787_s12 = sphi %s834_s12, %s1086_s12  }
   0x9   : > { %s35_s20 = sadd.s32 1, %s803_s16  ;;  %s44_s21 = sadd.s32 1, %s795_s14 }
   0xa   : > { %p37_p0 = scmp.ge.s32.totalorder %s35_s20, 2  ;;  %p51_p1 = scmp.ne.s32.totalorder %s795_s14, %s791_s13 }
   0xb   : > { %p52_p2 = scmp.eq.s32.totalorder %s807_s17, 0  ;;  %p57_p3 = scmp.ne.s32.totalorder %s791_s13, %s787_s12 }
   0xc   : > { %s1092_s20 = smov (%p37_p0, %s35_s20), 0  ;;  %p58_p5 = scmp.eq.s32.totalorder %s865_s18, 0 }
   0xd   : > { %p877_p4 = por %p52_p2, %p51_p1  ;;  %s39_s23 = ssub.s32 %s803_s16, %s1092_s20 }
   0xe   : > { %p83_p6 = scmp.eq.s32.totalorder %s865_s18, 1  ;;  %p42_p7 = scmp.eq.s32.totalorder %s39_s23, 0 }
   0xf   : > { %p885_p8 = por %p58_p5, %p57_p3  ;;  %p89_p10 = scmp.eq.s32.totalorder %s539_s19, 1 }
  0x10   : > { %p889_p9 = por %p83_p6, %p51_p1  ;;  %p587_p13 = scmp.lt.s32.totalorder %s807_s17, 2 }
  0x11   : > { %s896_s26 = scalar_select %p42_p7, %s795_s14, %s44_s21  }
  0x12   : > { %p898_p11 = por %p89_p10, %p57_p3  ;;  %s165_s28 = sand.u32 1, %s795_s14  }
  0x13   : > { %s542_s29 = sshll.u32 %s165_s28, 3  ;;  %s561_s30 = sshll.u32 %s803_s16, 7 }
  0x14   : > { %s1080_s27 = scalar_select %p898_p11, 1, 0 }
  0x15   : > { %s177_s6 = scalar_lea.hbm %s1073_s0, %s561_s30  ;;  %s169_s7 = scalar_lea.vmem [#allocation2], %s542_s29 }
  0x16   : > { %s179_s8 = sshll.u32 %s169_s7, 4  ;;  %p911_p0 = pnand %p587_p13, %p877_p4  ;;  %s180_s8 = int_to_ptr.vmem [resolvable:$true] %s179_s8 }
  0x17   : > { %p545_p1 = scmp.ge.s32.totalorder %s807_s17, 1  ;;  %p184_p2 = scmp.lt.s32.totalorder %s807_s17, 3 }
  0x18   : > { %s166_s10 = scalar_lea.sflag [#allocation3], %s165_s28  ;;  %p645_p3 = pneg %p911_p0 }
  0x19   : > { %s656_s11 = scalar_lea.vmem %s180_s8, 128  ;;  %s809_s21 = smov [#allocation2]  }
  0x1a   : > { %p657_p5 = scmp.ne.s32.totalorder %s180_s8, %s656_s11  ;;  %s661_s23 = sshll.u32 %s809_s21, 4  ;;  %s662_s23 = int_to_ptr.vmem [resolvable:$false] %s661_s23 }
  0x1b   : > { %s663_s29 = scalar_lea.vmem %s662_s23, 256  ;;  %p664_p10 = scmp.lt.s32.totalorder %s180_s8, %s662_s23 }
  0x1c   : > { %p659_p6 = pnand %p657_p5, %p645_p3  ;;  %p665_p12 = scmp.lt.s32.totalorder %s663_s29, %s656_s11 }
  0x1e   : > { %p660_p7 = pneg %p659_p6  ;;  %p666_p4 = por %p665_p12, %p664_p10 }
  0x20   : > { %p667_p13 = pnand %p666_p4, %p660_p7 }
  0x22   : > { %670 = shalt.err (!%p667_p13)
}
  0x23   : > { %576 = dma.hbm_to_vmem [thread:$0]  (!%p911_p0), %s177_s6, 128, %s180_s8, %s166_s10  }
  0x24   : > { %p185_p11 = pnand %p545_p1, %p184_p2 }
  0x25   : > { %s926_s22 = sand.u32 (!%p185_p11), 1, %s791_s13  }
  0x26   : > { %188 = sbr.rel (%p185_p11) target bundleno = 151 (0x97), region = 24  ;;  %s546_s28 = sshll.u32 (!%p185_p11), %s926_s22, 3 }
  0x27   : > { %s191_s30 = scalar_lea.sflag (!%p185_p11), [#allocation3], %s926_s22  ;;  %s194_s4 = scalar_lea.vmem (!%p185_p11), [#allocation2], %s546_s28 }
  0x2b   : > { %774 = dma.done.wait (%p885_p8), %s191_s30, 128  }
  0x2c   : > { %776 = vsyncadd (%p885_p8), %s191_s30, 4294967168  ;;  %vm235_vm0 = vcmask 1043456   ;;  %v231_v0 = vld [vmem:[%s194_s4] sm:$0xff]  ;;  %v810_v11 = vmov 1966171168   ;;  %v292_v13 = vlaneseq  ;;  %s548_s24 = sshll.u32 %s926_s22, 1 }
  0x2d   : > { %v233_v1 = vcombine.high %v231_v0, %v231_v0  ;;  %v236_v2 = vsel %vm235_vm0, %v231_v0, 0.0  ;;  %v290_v12 = vunpack.c.l.s4 %v810_v11  ;;  %s219_s5 = scalar_lea.vmem [#allocation6], %s548_s24  ;;  %s333_s7 = sand.u32 1, %s865_s18  }
  0x2e   : > { %v237_v3 = vrot.slane %v236_v2, 4  ;;  %v293_v19 = vshrl.u32 %v292_v13, 7  ;;  %s371_s6 = sshll.u32 %s219_s5, 4  ;;  %s563_s8 = sshll.u32 %s799_s15, 5  ;;  %vm946_vm1 = vcmp.lt.s32.totalorder %v292_v13, 256  ;;  %s950_s6 = int_to_ptr.vmem [resolvable:$true] %s371_s6 }
  0x2f   : > { %v243_v4 = vsel %vm235_vm0, %v233_v1, 0.0  ;;  %v291_v18 = vunpack.c.0.s8 %v290_v12  ;;  %s958_s10 = scalar_lea.hbm %s1075_s2, %s563_s8  ;;  %s963_s11 = scalar_lea.sflag [#allocation7], %s333_s7 }
  0x30   : > { %v238_v5 = vadd.f32 %v237_v3, %v236_v2  ;;  %v244_v6 = vrot.slane %v243_v4, 4  ;;  %s671_s21 = scalar_lea.vmem %s950_s6, 32  ;;  %s811_s23 = smov [#allocation6]  }
  0x31   : > { %v939_v23 = vsub.s32 %v291_v18, %v293_v19  ;;  %p672_p8 = scmp.ne.s32.totalorder %s950_s6, %s671_s21  ;;  %s675_s29 = sshll.u32 %s811_s23, 4  ;;  %s676_s29 = int_to_ptr.vmem [resolvable:$false] %s675_s29 }
  0x32   : > { %v239_v7 = vrot.slane %v238_v5, 2  ;;  %v245_v8 = vadd.f32 %v244_v6, %v243_v4  ;;  %s677_s30 = scalar_lea.vmem %s676_s29, 64  ;;  %p678_p0 = scmp.lt.s32.totalorder %s950_s6, %s676_s29 }
  0x33   : > { %p673_p11 = pnand %p672_p8, %p889_p9  ;;  %p679_p1 = scmp.lt.s32.totalorder %s677_s30, %s671_s21 }
  0x34   : > { %v240_v9 = vadd.f32 %v239_v7, %v238_v5  ;;  %v246_v10 = vrot.slane %v245_v8, 2 }
  0x35   : > { %p674_p12 = pneg %p673_p11  ;;  %p680_p2 = por %p679_p1, %p678_p0 }
  0x36   : > { %v241_v14 = vrot.slane %v240_v9, 1  ;;  %v247_v15 = vadd.f32 %v246_v10, %v245_v8 }
  0x37   : > { %p681_p3 = pnand %p680_p2, %p674_p12 }
  0x38   : > { %v242_v16 = vadd.f32 %v241_v14, %v240_v9  ;;  %v248_v17 = vrot.slane %v247_v15, 1 }
  0x3a   : > { %v249_v20 = vadd.f32 %v248_v17, %v247_v15  ;;  %v250_v21 = vmul.f32 0.25, %v242_v16 }
  0x3c   : > { %v251_v22 = vmul.f32 0.25, %v249_v20 }
  0x3e   : > { %v254_v24 = vcombine.low %v250_v21, %v251_v22 }
  0x40   : > { %v295_v25 = vrot.slane %v254_v24, %v939_v23  ;;  %v256_v26 = vsub.f32 %v231_v0, %v254_v24 }
  0x42   : > { %v302_v28 = vrot.slane %v295_v25, %v939_v23  ;;  %v257_v29 = vmul.f32 %v256_v26, %v256_v26 }
  0x44   : > { %308 = vst.msk [vmem:[%s219_s5] sm:$0x3] %vm946_vm1, %v302_v28  ;;  %v259_v30 = vcombine.high %v257_v29, %v257_v29  ;;  %v261_v31 = vsel %vm235_vm0, %v257_v29, 0.0 }
  0x45   : > { %v262_v32 = vrot.slane %v261_v31, 4 }
  0x46   : > { %684 = shalt.err (!%p681_p3)
}
  0x47   : > { %s685_s4 = scalar_lea.hbm %s958_s10, 32  ;;  %s689_s9 = scalar_lea.hbm %s1075_s2, 64 }
  0x48   : > { %p686_p5 = scmp.ne.s32.totalorder %s958_s10, %s685_s4  ;;  %p690_p10 = scmp.lt.s32.totalorder %s958_s10, %s1075_s2 }
  0x49   : > { %p691_p4 = scmp.lt.s32.totalorder %s689_s9, %s685_s4 }
  0x4a   : > { %p687_p6 = pnand %p686_p5, %p889_p9 }
  0x4b   : > { %p692_p13 = por %p691_p4, %p690_p10 }
  0x4c   : > { %p688_p7 = pneg %p687_p6 }
  0x4e   : > { %p693_p8 = pnand %p692_p13, %p688_p7 }
  0x50   : > { %696 = shalt.err (!%p693_p8)
}
  0x51   : > { %568 = dma.vmem_to_hbm [thread:$0]  (%p889_p9), %s950_s6, 32, %s958_s10, %s963_s11   ;;  %v268_v33 = vsel %vm235_vm0, %v259_v30, 0.0  ;;  %v263_v34 = vadd.f32 %v262_v32, %v261_v31 }
  0x52   : > { %v269_v35 = vrot.slane %v268_v33, 4  ;;  %s212_s6 = scalar_lea.vmem [#allocation5], %s546_s28  ;;  %s562_s21 = sshll.u32 %s799_s15, 7 }
  0x53   : > { %v264_v36 = vrot.slane %v263_v34, 2  ;;  %s355_s10 = sshll.u32 %s212_s6, 4  ;;  %s995_s4 = scalar_lea.hbm %s1074_s1, %s562_s21  ;;  %s990_s10 = int_to_ptr.vmem [resolvable:$true] %s355_s10 }
  0x54   : > { %v270_v37 = vadd.f32 %v269_v35, %v268_v33  ;;  %s999_s28 = scalar_lea.vmem [#allocation8], %s548_s24  ;;  %s329_s7 = scalar_lea.sflag [#allocation4], %s926_s22 }
  0x55   : > { %v265_v38 = vadd.f32 %v264_v36, %v263_v34  ;;  %s387_s5 = sshll.u32 %s999_s28, 4  ;;  %s697_s9 = scalar_lea.vmem %s990_s10, 128  ;;  %s388_s5 = int_to_ptr.vmem [resolvable:$true] %s387_s5 }
  0x56   : > { %v271_v39 = vrot.slane %v270_v37, 2  ;;  %p698_p11 = scmp.ne.s32.totalorder %s990_s10, %s697_s9  ;;  %s812_s18 = smov [#allocation5]  }
  0x57   : > { %v266_v40 = vrot.slane %v265_v38, 1  ;;  %s701_s23 = sshll.u32 %s812_s18, 4  ;;  %s702_s23 = int_to_ptr.vmem [resolvable:$false] %s701_s23 }
  0x58   : > { %v272_v41 = vadd.f32 %v271_v39, %v270_v37  ;;  %p699_p12 = pnand %p698_p11, %p889_p9  ;;  %s703_s29 = scalar_lea.vmem %s702_s23, 256 }
  0x59   : > { %v267_v42 = vadd.f32 %v266_v40, %v265_v38  ;;  %p704_p1 = scmp.lt.s32.totalorder %s990_s10, %s702_s23  ;;  %p705_p2 = scmp.lt.s32.totalorder %s703_s29, %s697_s9 }
  0x5a   : > { %v273_v43 = vrot.slane %v272_v41, 1  ;;  %p700_p0 = pneg %p699_p12 }
  0x5b   : > { %v275_v45 = vmul.f32 0.33333334, %v267_v42  ;;  %p706_p3 = por %p705_p2, %p704_p1 }
  0x5c   : > { %v274_v44 = vadd.f32 %v273_v43, %v272_v41 }
  0x5d   : > { %v277_v47 = vadd.f32 0.00015, %v275_v45  ;;  %p707_p5 = pnand %p706_p3, %p700_p0 }
  0x5e   : > { %v276_v46 = vmul.f32 0.33333334, %v274_v44 }
  0x5f   : > { %639 = vrsqrt.f32 %v277_v47 }
  0x60   : > { %v278_v48 = vadd.f32 0.00015, %v276_v46 }
  0x62   : > { %641 = vrsqrt.f32 %v278_v48 }
  0x6c   : > { %v640_v49 = vpop.eup %639 }
  0x6d   : > { %v281_v50 = vmul.f32 %v640_v49, %v277_v47 }
  0x6f   : > { %v642_v51 = vpop.eup %641 }
  0x70   : > { %v285_v52 = vcombine.low %v640_v49, %v642_v51  ;;  %v282_v53 = vmul.f32 %v642_v51, %v278_v48 }
  0x72   : > { %v287_v54 = vmul.f32 %v285_v52, %v256_v26  ;;  %v311_v55 = vcombine.low %v281_v50, %v282_v53 }
  0x74   : > { %288 = vst [vmem:[%s212_s6] sm:$0xff] %v287_v54  ;;  %v318_v56 = vrot.slane %v311_v55, %v939_v23 }
  0x75   : > { %710 = shalt.err (!%p707_p5)
}
  0x76   : > { %s711_s24 = scalar_lea.hbm %s995_s4, 128  ;;  %s715_s21 = scalar_lea.hbm %s1074_s1, 256 }
  0x77   : > { %p712_p6 = scmp.ne.s32.totalorder %s995_s4, %s711_s24  ;;  %p716_p4 = scmp.lt.s32.totalorder %s995_s4, %s1074_s1 }
  0x78   : > { %p717_p13 = scmp.lt.s32.totalorder %s715_s21, %s711_s24 }
  0x79   : > { %p713_p7 = pnand %p712_p6, %p889_p9 }
  0x7a   : > { %p718_p8 = por %p717_p13, %p716_p4 }
  0x7b   : > { %p714_p10 = pneg %p713_p7 }
  0x7d   : > { %p719_p11 = pnand %p718_p8, %p714_p10 }
  0x7f   : > { %722 = shalt.err (!%p719_p11)
}
  0x80   : > { %567 = dma.vmem_to_hbm [thread:$0]  (%p889_p9), %s990_s10, 128, %s995_s4, %s329_s7   ;;  %v325_v57 = vrot.slane %v318_v56, %v939_v23 }
  0x81   : > { %s385_s29 = scalar_lea.hbm %s1076_s3, %s563_s8  ;;  %s723_s24 = scalar_lea.vmem %s388_s5, 32 }
  0x82   : > { %327 = vst.msk [vmem:[%s999_s28] sm:$0x3] %vm946_vm1, %v325_v57  ;;  %p724_p12 = scmp.ne.s32.totalorder %s388_s5, %s723_s24  ;;  %s813_s22 = smov [#allocation8]  }
  0x83   : > { %s727_s6 = sshll.u32 %s813_s22, 4  ;;  %s728_s6 = int_to_ptr.vmem [resolvable:$false] %s727_s6 }
  0x84   : > { %p725_p0 = pnand %p724_p12, %p889_p9  ;;  %s729_s10 = scalar_lea.vmem %s728_s6, 64 }
  0x85   : > { %p730_p2 = scmp.lt.s32.totalorder %s388_s5, %s728_s6  ;;  %p731_p3 = scmp.lt.s32.totalorder %s729_s10, %s723_s24 }
  0x86   : > { %p726_p1 = pneg %p725_p0 }
  0x87   : > { %p732_p5 = por %p731_p3, %p730_p2 }
  0x89   : > { %p733_p6 = pnand %p732_p5, %p726_p1 }
  0x8b   : > { %736 = shalt.err (!%p733_p6)
}
  0x8c   : > { %s737_s15 = scalar_lea.hbm %s385_s29, 32  ;;  %s741_s28 = scalar_lea.hbm %s1076_s3, 64 }
  0x8d   : > { %p738_p7 = scmp.ne.s32.totalorder %s385_s29, %s737_s15  ;;  %p742_p13 = scmp.lt.s32.totalorder %s385_s29, %s1076_s3 }
  0x8e   : > { %p743_p8 = scmp.lt.s32.totalorder %s741_s28, %s737_s15 }
  0x8f   : > { %p739_p10 = pnand %p738_p7, %p889_p9 }
  0x90   : > { %p744_p11 = por %p743_p8, %p742_p13 }
  0x91   : > { %p740_p4 = pneg %p739_p10 }
  0x93   : > { %p745_p12 = pnand %p744_p11, %p740_p4 }
  0x95   : > { %748 = shalt.err (!%p745_p12)
}
  0x96   : > { %569 = dma.vmem_to_hbm [thread:$0]  (%p889_p9), %s388_s5, 32, %s385_s29, %s963_s11  }
  0x97 PF: > { %s399_s30 = sand.u32 1, %s787_s12   ;;  %p1084_p0 = scmp.ne.s32.totalorder %s1080_s27, 0 }
  0x98   : > { %p1085_p1 = scmp.ge.s32.totalorder %s807_s17, 2  ;;  %s400_s18 = scalar_lea.sflag [#allocation4], %s399_s30 }
  0x9a   : > { %p578_p2 = pnand %p1085_p1, %p1084_p0 }
  0x9c   : > { %p579_p3 = pneg %p578_p2 }
  0x9e   : > { %778 = dma.done.wait (%p579_p3), %s400_s18, 128  }
  0x9f   : > { %780 = vsyncadd (%p579_p3), %s400_s18, 4294967168  ;;  %s408_s9 = sand.u32 1, %s539_s19  }
  0xa0   : > { %s409_s23 = scalar_lea.sflag [#allocation7], %s408_s9 }
  0xa1   : > { %782 = dma.done.wait (%p579_p3), %s409_s23, 64  }
  0xa2   : > { %784 = vsyncadd (%p579_p3), %s409_s23, 4294967232  ;;  %s23_s17 = sadd.s32 1, %s807_s17   ;;  %s1086_s12 = smov %s791_s13 }
  0xa3   : > { %p20_p9 = scmp.ge.s32.totalorder %s23_s17, 4   ;;  %s1087_s13 = smov %s795_s14 }
  0xa4   : > { %s1088_s14 = smov %s896_s26  ;;  %s1089_s15 = smov %s803_s16 }
  0xa5   : > { %s1090_s16 = smov %s1092_s20  ;;  %22 = sbr.rel (!%p20_p9) target bundleno = 8 (0x8), region = 101 }
  0xaa   :  { %423 = vsyncpa [#allocation3], 1 }
  0xab   :  { %425 = vsyncpa [#allocation3 + $0x1], 1 }
  0xac   :  { %426 = vsyncpa [#allocation4], 1 }
  0xad   :  { %428 = vsyncpa [#allocation4 + $0x1], 1 }
  0xae   :  { %429 = vsyncpa [#allocation7], 1 }
  0xaf   :  { %431 = vsyncpa [#allocation7 + $0x1], 1 }

</bundles_post_ra>
